<compile_context>
chip_gen: v7x
topology: tpu7x:2x2x1
jax: 0.10.0
libtpu: 0.0.40
codegen_flags: <defaults>
</compile_context>

<pallas_src>
import functools

import jax
import jax.numpy as jnp
from jax import lax
from jax.experimental import pallas as pl
from jax.experimental.pallas import tpu as pltpu


# ----------------------------- helpers (JAX) --------------------------------

def _interp_matrix(n_in, n_out):
    """Bilinear (align_corners=True) 1-D interpolation matrix (n_out, n_in)."""
    if n_in == 1:
        return jnp.ones((n_out, 1), jnp.float32)
    src = jnp.arange(n_out, dtype=jnp.float32) * (n_in - 1) / (n_out - 1)
    lo = jnp.clip(jnp.floor(src).astype(jnp.int32), 0, n_in - 2)
    frac = src - lo.astype(jnp.float32)
    idx = jnp.arange(n_out)
    A = jnp.zeros((n_out, n_in), jnp.float32)
    A = A.at[idx, lo].add(1.0 - frac)
    A = A.at[idx, lo + 1].add(frac)
    return A


def _fold_bn(w, bias, bn, eps=1e-5):
    """Fold eval-mode BN into (..., out_ch) conv weights; bf16 w, f32 bias."""
    gamma, beta, mean, var = bn
    s = gamma / jnp.sqrt(var + eps)
    wf = (w * s).astype(jnp.bfloat16)
    bf = ((bias - mean) * s + beta).astype(jnp.float32).reshape(1, -1)
    return wf, bf


# ------------------- kernel 1: upsample + concat + halo ---------------------

def _up_concat_kernel(sw_ref, x1_ref, *rest, H, Ho, Wo, C2):
    if C2 > 0:
        x2_ref, o_ref = rest
    else:
        (o_ref,) = rest

    # Zero the whole padded block: gives the 3x3 convs their zero halo for
    # free (no separate jnp.pad pass over HBM).
    o_ref[...] = jnp.zeros_like(o_ref)

    # Skip connection -> channels [0, C2).
    if C2 > 0:
        o_ref[0, 1:Ho + 1, 1:Wo + 1, 0:C2] = x2_ref[0].astype(o_ref.dtype)

    sw = sw_ref[...]                                   # (Wo, W) f32
    scale = (H - 1) / (Ho - 1)

    def body(io, carry):
        if H == 1:
            row = x1_ref[0, 0]                         # (W, C1)
        else:
            src = io.astype(jnp.float32) * scale
            lo = jnp.clip(src.astype(jnp.int32), 0, H - 2)
            fh = src - lo.astype(jnp.float32)
            ra = x1_ref[0, lo]                         # (W, C1) f32
            rb = x1_ref[0, lo + 1]
            row = ra * (1.0 - fh) + rb * fh            # VPU 2-tap H blend
        up_row = jnp.dot(sw, row, preferred_element_type=jnp.float32)  # (Wo,C1)
        o_ref[0, io + 1, 1:Wo + 1, C2:] = up_row.astype(o_ref.dtype)
        return carry

    lax.fori_loop(0, Ho, body, 0)


def upsample_concat_pad(x1_nhwc, x2_nhwc):
    """Returns the zero-padded NHWC concat([x2, up2x(x1)]) slab in bf16."""
    N, H, W, C1 = x1_nhwc.shape
    Ho, Wo = 2 * H, 2 * W
    C2 = 0 if x2_nhwc is None else x2_nhwc.shape[-1]
    Ct = C1 + C2
    Hp, Wp = Ho + 2, Wo + 2

    sw = _interp_matrix(W, Wo)                         # (Wo, W) f32

    in_specs = [
        pl.BlockSpec((Wo, W), lambda n: (0, 0)),
        pl.BlockSpec((1, H, W, C1), lambda n: (n, 0, 0, 0)),
    ]
    args = [sw, x1_nhwc]
    if C2 > 0:
        in_specs.append(pl.BlockSpec((1, Ho, Wo, C2), lambda n: (n, 0, 0, 0)))
        args.append(x2_nhwc)

    kernel = functools.partial(_up_concat_kernel, H=H, Ho=Ho, Wo=Wo, C2=C2)
    return pl.pallas_call(
        kernel,
        out_shape=jax.ShapeDtypeStruct((N, Hp, Wp, Ct), jnp.bfloat16),
        grid=(N,),
        in_specs=in_specs,
        out_specs=pl.BlockSpec((1, Hp, Wp, Ct), lambda n: (n, 0, 0, 0)),
        compiler_params=pltpu.CompilerParams(dimension_semantics=("parallel",)),
    )(*args)


# ---------------------- kernel 2: fused DoubleConv ---------------------------

def _double_conv_kernel(xp_ref, w1_ref, b1_ref, wi_ref, bi_ref, w2_ref, b2_ref,
                        o_ref, h1p_ref, *, H, W):
    Ct = xp_ref.shape[-1]
    O = o_ref.shape[-1]

    # conv3x3 #1: 9-tap matmul accumulation over shifted VMEM slices (no
    # im2col); the 1x1 identity branch is fused on the centre tap.
    acc = jnp.zeros((H * W, O), jnp.float32)
    ident = None
    for di in range(3):
        for dj in range(3):
            tap = xp_ref[0, di:di + H, dj:dj + W, :].reshape(H * W, Ct)
            acc = acc + jnp.dot(tap, w1_ref[di * 3 + dj],
                                preferred_element_type=jnp.float32)
            if di == 1 and dj == 1:
                ident = jnp.dot(tap, wi_ref[...],
                                preferred_element_type=jnp.float32) + bi_ref[...]
    h1 = jnp.maximum(acc + b1_ref[...], 0.0).astype(jnp.bfloat16)

    # Stage h1 in a zero-padded VMEM scratch: conv #2 sees its halo without
    # any HBM round trip of the intermediate activation.
    h1p_ref[...] = jnp.zeros_like(h1p_ref)
    h1p_ref[1:H + 1, 1:W + 1, :] = h1.reshape(H, W, O)

    # conv3x3 #2 + residual + final ReLU.
    acc2 = jnp.zeros((H * W, O), jnp.float32)
    for di in range(3):
        for dj in range(3):
            tap = h1p_ref[di:di + H, dj:dj + W, :].reshape(H * W, O)
            acc2 = acc2 + jnp.dot(tap, w2_ref[di * 3 + dj],
                                  preferred_element_type=jnp.float32)
    out = jnp.maximum(acc2 + b2_ref[...] + ident, 0.0)
    o_ref[0] = out.astype(o_ref.dtype)


def double_conv(xpad, w1, b1, wi, bi, w2, b2):
    N, Hp, Wp, Ct = xpad.shape
    H, W = Hp - 2, Wp - 2
    O = w1.shape[-1]

    kernel = functools.partial(_double_conv_kernel, H=H, W=W)
    return pl.pallas_call(
        kernel,
        out_shape=jax.ShapeDtypeStruct((N, H * W, O), jnp.float32),
        grid=(N,),
        in_specs=[
            pl.BlockSpec((1, Hp, Wp, Ct), lambda n: (n, 0, 0, 0)),
            pl.BlockSpec((9, Ct, O), lambda n: (0, 0, 0)),
            pl.BlockSpec((1, O), lambda n: (0, 0)),
            pl.BlockSpec((Ct, O), lambda n: (0, 0)),
            pl.BlockSpec((1, O), lambda n: (0, 0)),
            pl.BlockSpec((9, O, O), lambda n: (0, 0, 0)),
            pl.BlockSpec((1, O), lambda n: (0, 0)),
        ],
        out_specs=pl.BlockSpec((1, H * W, O), lambda n: (n, 0, 0)),
        scratch_shapes=[pltpu.VMEM((Hp, Wp, O), jnp.bfloat16)],
        compiler_params=pltpu.CompilerParams(dimension_semantics=("parallel",)),
    )(xpad, w1, b1, wi, bi, w2, b2)


# ------------------------------ Up forward -----------------------------------

def up_forward(params, x1, x2=None):
    """x1: (N, in_ch1, H, W); x2: (N, in_ch2, 2H, 2W) or None. Returns NCHW."""
    N, C1, H, W = x1.shape
    Ho, Wo = 2 * H, 2 * W
    C2 = 0 if x2 is None else x2.shape[1]
    Ct = C1 + C2
    O = params["w1"].shape[0]

    # single NCHW -> NHWC transpose per input; NHWC everywhere inside.
    x1_nhwc = jnp.transpose(x1, (0, 2, 3, 1))
    x2_nhwc = None if x2 is None else jnp.transpose(x2, (0, 2, 3, 1))

    # kernel 1: upsample + concat + zero halo (bf16 slab).
    xpad = upsample_concat_pad(x1_nhwc, x2_nhwc)            # (N, Ho+2, Wo+2, Ct)

    # fold eval-mode BN into bf16 conv weights / f32 biases.
    w1 = params["w1"].transpose(2, 3, 1, 0).reshape(9, Ct, O)
    w1f, b1f = _fold_bn(w1, params["b1"], params["bn1"])
    wi = params["wi"][:, :, 0, 0].T                         # (Ct, O)
    wif, bif = _fold_bn(wi, params["bi"], params["bni"])
    w2 = params["w2"].transpose(2, 3, 1, 0).reshape(9, O, O)
    w2f, b2f = _fold_bn(w2, params["b2"], params["bn2"])

    # kernel 2: fused DoubleConv (conv+BN+ReLU, conv+BN, identity, add, ReLU).
    out = double_conv(xpad, w1f, b1f, wif, bif, w2f, b2f)   # (N, Ho*Wo, O) f32
    out = out.reshape(N, Ho, Wo, O)
    return jnp.transpose(out, (0, 3, 1, 2))                 # single exit transpose


# --------------------------- params & reference ------------------------------

def init_params(key, in_ch1, in_ch2, out_ch):
    cin = in_ch1 + in_ch2
    ks = jax.random.split(key, 9)

    def conv_w(k, cout, cin_, kh, kw):
        return 0.1 * jax.random.normal(k, (cout, cin_, kh, kw), jnp.float32)

    def bn(k, c):
        k1, k2, k3, k4 = jax.random.split(k, 4)
        gamma = 1.0 + 0.1 * jax.random.normal(k1, (c,), jnp.float32)
        beta = 0.1 * jax.random.normal(k2, (c,), jnp.float32)
        mean = 0.1 * jax.random.normal(k3, (c,), jnp.float32)
        var = jnp.abs(jax.random.normal(k4, (c,), jnp.float32)) + 0.5
        return gamma, beta, mean, var

    return dict(
        w1=conv_w(ks[0], out_ch, cin, 3, 3),
        b1=0.1 * jax.random.normal(ks[1], (out_ch,), jnp.float32),
        bn1=bn(ks[2], out_ch),
        w2=conv_w(ks[3], out_ch, out_ch, 3, 3),
        b2=0.1 * jax.random.normal(ks[4], (out_ch,), jnp.float32),
        bn2=bn(ks[5], out_ch),
        wi=conv_w(ks[6], out_ch, cin, 1, 1),
        bi=0.1 * jax.random.normal(ks[7], (out_ch,), jnp.float32),
        bni=bn(ks[8], out_ch),
    )


def reference_up(params, x1, x2):
    """Pure-JAX f32 reference (lax.conv + einsum upsample) for validation."""
    N, C1, H, W = x1.shape
    Ah = _interp_matrix(H, 2 * H)
    Aw = _interp_matrix(W, 2 * W)
    x1u = jnp.einsum('oh,nchw,pw->ncop', Ah, x1, Aw)
    x = x1u if x2 is None else jnp.concatenate([x2, x1u], axis=1)

    def conv(z, w, b, pad):
        y = lax.conv_general_dilated(
            z, w, (1, 1), [(pad, pad), (pad, pad)],
            dimension_numbers=('NCHW', 'OIHW', 'NCHW'))
        return y + b[None, :, None, None]

    def bn(z, p, eps=1e-5):
        g, be, m, v = p
        return ((z - m[None, :, None, None]) /
                jnp.sqrt(v[None, :, None, None] + eps)
                ) * g[None, :, None, None] + be[None, :, None, None]

    h = jax.nn.relu(bn(conv(x, params["w1"], params["b1"], 1), params["bn1"]))
    h = bn(conv(h, params["w2"], params["b2"], 1), params["bn2"])
    ident = bn(conv(x, params["wi"], params["bi"], 0), params["bni"])
    return jax.nn.relu(h + ident)


# ---------------------------------- main --------------------------------------

if __name__ == "__main__":
    key = jax.random.PRNGKey(0)
    in_ch1, in_ch2, out_ch = 8, 4, 8
    N, H, W = 2, 8, 8

    k1, k2, k3 = jax.random.split(key, 3)
    x1 = jax.random.normal(k1, (N, in_ch1, H, W), jnp.float32)
    x2 = jax.random.normal(k2, (N, in_ch2, 2 * H, 2 * W), jnp.float32)
    params = init_params(k3, in_ch1, in_ch2, out_ch)

    out = up_forward(params, x1, x2)
    out = jax.block_until_ready(out)
    assert out.shape == (N, out_ch, 2 * H, 2 * W), out.shape

    ref = reference_up(params, x1, x2)
    # bf16 MXU operands (f32 accumulation) => ~1e-2 relative error budget.
    max_err = float(jnp.max(jnp.abs(out - ref)))
    if not jnp.allclose(out, ref, atol=5e-2, rtol=5e-2):
        raise AssertionError(
            f"Pallas result mismatch vs. JAX reference (max|diff|={max_err})")

    print("KERNEL_OK")
</pallas_src>

<mosaic_0001>
module attributes {stable_mosaic.version = 11 : i64} {
  func.func @_up_concat_kernel(%arg0: i32, %arg1: memref<16x8xf32, #tpu.memory_space<vmem>>, %arg2: memref<1x8x8x8xf32, #tpu.memory_space<vmem>>, %arg3: memref<1x16x16x4xf32, #tpu.memory_space<vmem>>, %arg4: memref<1x18x18x12xbf16, #tpu.memory_space<vmem>>) attributes {dimension_semantics = [#tpu.dimension_semantics<parallel>], iteration_bounds = array<i64: 2>, scalar_prefetch = 0 : i64, scratch_operands = 0 : i64, tpu.core_type = #tpu.core_type<tc>, window_params = [{pipeline_mode = #tpu.pipeline_mode<synchronous>, transform_indices = @transform_0, window_bounds = array<i64: 16, 8>}, {transform_indices = @transform_1, window_bounds = array<i64: 1, 8, 8, 8>}, {transform_indices = @transform_2, window_bounds = array<i64: 1, 16, 16, 4>}, {transform_indices = @transform_3, window_bounds = array<i64: 1, 18, 18, 12>}]} {
    %cst = arith.constant 0.000000e+00 : bf16
    %0 = vector.broadcast %cst : bf16 to vector<1x18x18x12xbf16>
    %c0 = arith.constant 0 : index
    %c0_0 = arith.constant 0 : index
    %c0_1 = arith.constant 0 : index
    %c0_2 = arith.constant 0 : index
    %1 = vector.load %arg4[%c0, %c0_0, %c0_1, %c0_2] : memref<1x18x18x12xbf16, #tpu.memory_space<vmem>>, vector<1x18x18x12xbf16>
    tpu.vector_store %arg4[%c0, %c0_0, %c0_1, %c0_2], %0 {strides = array<i32>} : memref<1x18x18x12xbf16, #tpu.memory_space<vmem>>, vector<1x18x18x12xbf16>,
    %c0_3 = arith.constant 0 : index
    %c0_4 = arith.constant 0 : index
    %c0_5 = arith.constant 0 : index
    %c0_6 = arith.constant 0 : index
    %2 = vector.load %arg3[%c0_3, %c0_4, %c0_5, %c0_6] : memref<1x16x16x4xf32, #tpu.memory_space<vmem>>, vector<1x16x16x4xf32>
    %3 = vector.shape_cast %2 : vector<1x16x16x4xf32> to vector<16x16x4xf32>
    %4 = arith.truncf %3 : vector<16x16x4xf32> to vector<16x16x4xbf16>
    %c0_7 = arith.constant 0 : index
    %c1 = arith.constant 1 : index
    %c1_8 = arith.constant 1 : index
    %c0_9 = arith.constant 0 : index
    %5 = vector.load %arg4[%c0_7, %c1, %c1_8, %c0_9] : memref<1x18x18x12xbf16, #tpu.memory_space<vmem>>, vector<1x16x16x4xbf16>
    %6 = vector.shape_cast %5 : vector<1x16x16x4xbf16> to vector<16x16x4xbf16>
    %7 = vector.shape_cast %4 : vector<16x16x4xbf16> to vector<1x16x16x4xbf16>
    tpu.vector_store %arg4[%c0_7, %c1, %c1_8, %c0_9], %7 {strides = array<i32>} : memref<1x18x18x12xbf16, #tpu.memory_space<vmem>>, vector<1x16x16x4xbf16>,
    %c0_10 = arith.constant 0 : index
    %c0_11 = arith.constant 0 : index
    %8 = vector.load %arg1[%c0_10, %c0_11] : memref<16x8xf32, #tpu.memory_space<vmem>>, vector<16x8xf32>
    %c0_i32 = arith.constant 0 : i32
    %c16_i32 = arith.constant 16 : i32
    %9 = arith.addi %c0_i32, %c16_i32 : i32
    %c1_i32 = arith.constant 1 : i32
    scf.for %arg5 = %c0_i32 to %9 step %c1_i32  : i32 {
      %10 = arith.sitofp %arg5 : i32 to f32
      %cst_13 = arith.constant 0.466666669 : f32
      %11 = arith.mulf %10, %cst_13 : f32
      %12 = arith.fptosi %11 : f32 to i32
      %c0_i32_14 = arith.constant 0 : i32
      %c6_i32 = arith.constant 6 : i32
      %13 = arith.maxsi %c0_i32_14, %12 : i32
      %14 = arith.minsi %c6_i32, %13 : i32
      %15 = arith.sitofp %14 : i32 to f32
      %16 = arith.subf %11, %15 : f32
      %c0_15 = arith.constant 0 : index
      %17 = arith.index_cast %14 : i32 to index
      %c0_16 = arith.constant 0 : index
      %c0_17 = arith.constant 0 : index
      %18 = vector.load %arg2[%c0_15, %17, %c0_16, %c0_17] : memref<1x8x8x8xf32, #tpu.memory_space<vmem>>, vector<1x1x8x8xf32>
      %19 = vector.shape_cast %18 : vector<1x1x8x8xf32> to vector<8x8xf32>
      %c1_i32_18 = arith.constant 1 : i32
      %20 = arith.addi %14, %c1_i32_18 : i32
      %c0_19 = arith.constant 0 : index
      %21 = arith.index_cast %20 : i32 to index
      %c0_20 = arith.constant 0 : index
      %c0_21 = arith.constant 0 : index
      %22 = vector.load %arg2[%c0_19, %21, %c0_20, %c0_21] : memref<1x8x8x8xf32, #tpu.memory_space<vmem>>, vector<1x1x8x8xf32>
      %23 = vector.shape_cast %22 : vector<1x1x8x8xf32> to vector<8x8xf32>
      %cst_22 = arith.constant 1.000000e+00 : f32
      %24 = arith.subf %cst_22, %16 : f32
      %25 = vector.broadcast %24 : f32 to vector<8x8xf32>
      %26 = arith.mulf %19, %25 : vector<8x8xf32>
      %27 = vector.broadcast %16 : f32 to vector<8x8xf32>
      %28 = arith.mulf %23, %27 : vector<8x8xf32>
      %29 = arith.addf %26, %28 : vector<8x8xf32>
      %cst_23 = arith.constant dense<0.000000e+00> : vector<16x8xf32>
      %30 = tpu.matmul %8, %29, %cst_23 {dimension_numbers = #tpu.dot_dimension_numbers<[1], [0], [0], [1], [0, 0, 1, 1], [], []>} : vector<16x8xf32>, vector<8x8xf32>, vector<16x8xf32> -> vector<16x8xf32>
      %31 = arith.truncf %30 : vector<16x8xf32> to vector<16x8xbf16>
      %c1_i32_24 = arith.constant 1 : i32
      %32 = arith.addi %arg5, %c1_i32_24 : i32
      %c0_25 = arith.constant 0 : index
      %33 = arith.index_cast %32 : i32 to index
      %c1_26 = arith.constant 1 : index
      %c4 = arith.constant 4 : index
      %34 = vector.load %arg4[%c0_25, %33, %c1_26, %c4] : memref<1x18x18x12xbf16, #tpu.memory_space<vmem>>, vector<1x1x16x8xbf16>
      %35 = vector.shape_cast %34 : vector<1x1x16x8xbf16> to vector<16x8xbf16>
      %36 = vector.shape_cast %31 : vector<16x8xbf16> to vector<1x1x16x8xbf16>
      tpu.vector_store %arg4[%c0_25, %33, %c1_26, %c4], %36 {strides = array<i32>} : memref<1x18x18x12xbf16, #tpu.memory_space<vmem>>, vector<1x1x16x8xbf16>,
    }
    %c16_i32_12 = arith.constant 16 : i32
    return
  }
  func.func @transform_0(%arg0: i32) -> (i32, i32) {
    %c0_i32 = arith.constant 0 : i32
    %c0_i32_0 = arith.constant 0 : i32
    %c0_i32_1 = arith.constant 0 : i32
    return %c0_i32, %c0_i32_0 : i32, i32
  }
  func.func @transform_1(%arg0: i32) -> (i32, i32, i32, i32) {
    %c0_i32 = arith.constant 0 : i32
    %c0_i32_0 = arith.constant 0 : i32
    %c0_i32_1 = arith.constant 0 : i32
    %c0_i32_2 = arith.constant 0 : i32
    return %arg0, %c0_i32, %c0_i32_0, %c0_i32_1 : i32, i32, i32, i32
  }
  func.func @transform_2(%arg0: i32) -> (i32, i32, i32, i32) {
    %c0_i32 = arith.constant 0 : i32
    %c0_i32_0 = arith.constant 0 : i32
    %c0_i32_1 = arith.constant 0 : i32
    %c0_i32_2 = arith.constant 0 : i32
    return %arg0, %c0_i32, %c0_i32_0, %c0_i32_1 : i32, i32, i32, i32
  }
  func.func @transform_3(%arg0: i32) -> (i32, i32, i32, i32) {
    %c0_i32 = arith.constant 0 : i32
    %c0_i32_0 = arith.constant 0 : i32
    %c0_i32_1 = arith.constant 0 : i32
    %c0_i32_2 = arith.constant 0 : i32
    return %arg0, %c0_i32, %c0_i32_0, %c0_i32_1 : i32, i32, i32, i32
  }
}

</mosaic_0001>

<bundles_post_ra>
// kernel: tpu_custom_call.1
= control target key start
LH: loop header
LB: loop body
LE: loop exit
PB: predicated region body
PF: predicated region fallthrough
CT: control target
= control target key end

     0   :  { %s1307_s12 = smov 0   ;;  %s1712_s0 = inlined_call_operand.vmem [shape: f32[16,8], index: 0, kind: input, shape index: {}]   ;;  %s1713_s1 = inlined_call_operand.vmem [shape: f32[2,8,8,8], index: 1, kind: input, shape index: {}]   ;;  %s1714_s2 = inlined_call_operand.vmem [shape: f32[2,16,16,4], index: 2, kind: input, shape index: {}]   ;;  %s1715_s3 = inlined_call_operand.vmem [shape: bf16[2,18,18,12], index: 3, kind: output, shape index: {}]  }
   0x1 LB: > { %s1058_s13 = sadd.s32 4294967295, %s1279_s12   ;;  %p1062_p0 = scmp.ge.s32.totalorder %s1279_s12, 1  ;;  %s1279_s12 = sphi %s1307_s12, %s13_s12  }
   0x2   : > { %p147_p1 = scmp.lt.s32.totalorder %s1279_s12, 3 }
   0x4   : > { %p148_p2 = pnand %p1062_p0, %p147_p1 }
   0x5   : > { %p176_p3 = scmp.lt.s32.totalorder (!%p148_p2), %s1058_s13, 1  ;;  %v1318_v0 = vld [vmem:[%s1712_s0] sm:$0xff] (!%p148_p2)  ;;  %v1323_v1 = vld [vmem:[%s1712_s0 + $0x8] sm:$0xff] (!%p148_p2)  ;;  %vm192_vm0 = vcmask (!%p148_p2), 93184   ;;  %vm195_vm1 = vcmask (!%p148_p2), 90112   ;;  %v1285_v2 = vmov (!%p148_p2), 0  }
   0x6   : > { %151 = sbr.rel (%p148_p2) target bundleno = 465 (0x1d1), region = 32  ;;  %vm701_vm2 = vsmask.f32 (!%p148_p2), 7938  ;;  %vm700_vm3 = vcmask (!%p148_p2), 27648   ;;  %vm376_vm4 = vsmask.f32 (!%p148_p2), 256 }
   0x7   : > { %vm708_vm5 = vcmask (!%p148_p2), 24576   ;;  %vm377_vm6 = vsmask.f32 (!%p148_p2), 4368  ;;  %vm1456_vm7 = vmand (!%p148_p2), %vm700_vm3, %vm701_vm2  ;;  %s1689_s30 = smov (!%p148_p2), 0  }
   0x8   : > { %vm1461_vm8 = vmor (!%p148_p2), %vm376_vm4, %vm377_vm6 }
   0x9   : > { %vm1467_vm9 = vmand (!%p148_p2), %vm708_vm5, %vm376_vm4 }
   0xd   : > { %s1723_s13 = smov (!%p176_p3, %s1058_s13), 1 }
   0xe   : > { %s1199_s18 = sshll.u32 %s1723_s13, 6  ;;  %s1245_s19 = smul.u32 216, %s1723_s13 }
   0xf   : > { %s1328_s22 = scalar_lea.vmem %s1713_s1, %s1199_s18  ;;  %s1200_s23 = sshll.u32 %s1723_s13, 8 }
  0x10   : > { %s1333_s26 = scalar_lea.vmem %s1715_s3, %s1245_s19  ;;  %s1338_s29 = scalar_lea.vmem %s1714_s2, %s1200_s23 }
  0x11   : > { %197 = vst.msk [vmem:[%s1333_s26 + $0xc] sm:$0xf] %vm192_vm0, %v1285_v2  ;;  %193 = vst.msk [vmem:[%s1333_s26] sm:$0xf] %vm192_vm0, %v1285_v2  ;;  %v248_v3 = vld [vmem:[%s1338_s29] sm:$0xff]  ;;  %v249_v4 = vld [vmem:[%s1338_s29 + $0x8] sm:$0xff] }
  0x12   : > { %194 = vst.msk [vmem:[%s1333_s26 + $0x4] sm:$0xf] %vm192_vm0, %v1285_v2  ;;  %198 = vst.msk [vmem:[%s1333_s26 + $0x10] sm:$0xf] %vm192_vm0, %v1285_v2  ;;  %v250_v5 = vld [vmem:[%s1338_s29 + $0x10] sm:$0xff]  ;;  %v1201_v6 = vpack.c.bf16 %v248_v3, %v248_v3  ;;  %v1202_v7 = vpack.c.bf16 %v249_v4, %v249_v4  ;;  %v251_v9 = vld [vmem:[%s1338_s29 + $0x18] sm:$0xff] }
  0x13   : > { %200 = vst.msk [vmem:[%s1333_s26 + $0x18] sm:$0xf] %vm192_vm0, %v1285_v2  ;;  %201 = vst.msk [vmem:[%s1333_s26 + $0x1c] sm:$0xf] %vm192_vm0, %v1285_v2  ;;  %v1203_v8 = vpack.c.bf16 %v250_v5, %v250_v5  ;;  %v252_v10 = vld [vmem:[%s1338_s29 + $0x20] sm:$0xff]  ;;  %v253_v11 = vld [vmem:[%s1338_s29 + $0x28] sm:$0xff]  ;;  %v1204_v12 = vpack.c.bf16 %v251_v9, %v251_v9 }
  0x14   : > { %203 = vst.msk [vmem:[%s1333_s26 + $0x24] sm:$0xf] %vm192_vm0, %v1285_v2  ;;  %204 = vst.msk [vmem:[%s1333_s26 + $0x28] sm:$0xf] %vm192_vm0, %v1285_v2  ;;  %v1205_v13 = vpack.c.bf16 %v252_v10, %v252_v10  ;;  %v1206_v14 = vpack.c.bf16 %v253_v11, %v253_v11  ;;  %v380_v15 = vshrl.u32 %v1201_v6, 16  ;;  %v383_v16 = vshll.u32 %v1201_v6, 16 }
  0x15   : > { %206 = vst.msk [vmem:[%s1333_s26 + $0x30] sm:$0xf] %vm192_vm0, %v1285_v2  ;;  %207 = vst.msk [vmem:[%s1333_s26 + $0x34] sm:$0xf] %vm192_vm0, %v1285_v2  ;;  %v388_v17 = vshrl.u32 %v1202_v7, 16  ;;  %v391_v18 = vshll.u32 %v1202_v7, 16 }
  0x16   : > { %209 = vst.msk [vmem:[%s1333_s26 + $0x3c] sm:$0xf] %vm192_vm0, %v1285_v2  ;;  %210 = vst.msk [vmem:[%s1333_s26 + $0x40] sm:$0xf] %vm192_vm0, %v1285_v2  ;;  %v397_v20 = vshrl.u32 %v1203_v8, 16  ;;  %v400_v21 = vshll.u32 %v1203_v8, 16 }
  0x17   : > { %212 = vst.msk [vmem:[%s1333_s26 + $0x48] sm:$0xf] %vm192_vm0, %v1285_v2  ;;  %213 = vst.msk [vmem:[%s1333_s26 + $0x4c] sm:$0xf] %vm192_vm0, %v1285_v2  ;;  %v405_v22 = vshrl.u32 %v1204_v12, 16  ;;  %v408_v23 = vshll.u32 %v1204_v12, 16 }
  0x18   : > { %215 = vst.msk [vmem:[%s1333_s26 + $0x54] sm:$0xf] %vm192_vm0, %v1285_v2  ;;  %216 = vst.msk [vmem:[%s1333_s26 + $0x58] sm:$0xf] %vm192_vm0, %v1285_v2  ;;  %v382_v24 = vrot.slane %v380_v15, 7  ;;  %v390_v26 = vrot.slane %v388_v17, 7 }
  0x19   : > { %218 = vst.msk [vmem:[%s1333_s26 + $0x60] sm:$0xf] %vm192_vm0, %v1285_v2  ;;  %219 = vst.msk [vmem:[%s1333_s26 + $0x64] sm:$0xf] %vm192_vm0, %v1285_v2  ;;  %v414_v27 = vshrl.u32 %v1205_v13, 16  ;;  %v417_v28 = vshll.u32 %v1205_v13, 16 }
  0x1a   : > { %221 = vst.msk [vmem:[%s1333_s26 + $0x6c] sm:$0xf] %vm192_vm0, %v1285_v2  ;;  %222 = vst.msk [vmem:[%s1333_s26 + $0x70] sm:$0xf] %vm192_vm0, %v1285_v2  ;;  %v399_v30 = vrot.slane %v397_v20, 7  ;;  %v407_v31 = vrot.slane %v405_v22, 7  ;;  %v385_v36 = vor.u32 %v383_v16, %v382_v24  ;;  %v393_v39 = vor.u32 %v391_v18, %v390_v26 }
  0x1b   : > { %224 = vst.msk [vmem:[%s1333_s26 + $0x78] sm:$0xf] %vm192_vm0, %v1285_v2  ;;  %225 = vst.msk [vmem:[%s1333_s26 + $0x7c] sm:$0xf] %vm192_vm0, %v1285_v2  ;;  %v422_v32 = vshrl.u32 %v1206_v14, 16  ;;  %v425_v33 = vshll.u32 %v1206_v14, 16 }
  0x1c   : > { %227 = vst.msk [vmem:[%s1333_s26 + $0x84] sm:$0xf] %vm192_vm0, %v1285_v2  ;;  %228 = vst.msk [vmem:[%s1333_s26 + $0x88] sm:$0xf] %vm192_vm0, %v1285_v2  ;;  %v254_v34 = vld [vmem:[%s1338_s29 + $0x30] sm:$0xff]  ;;  %v255_v35 = vld [vmem:[%s1338_s29 + $0x38] sm:$0xff]  ;;  %v402_v42 = vor.u32 %v400_v21, %v399_v30  ;;  %v410_v45 = vor.u32 %v408_v23, %v407_v31 }
  0x1d   : > { %230 = vst.msk [vmem:[%s1333_s26 + $0x90] sm:$0xf] %vm192_vm0, %v1285_v2  ;;  %231 = vst.msk [vmem:[%s1333_s26 + $0x94] sm:$0xf] %vm192_vm0, %v1285_v2  ;;  %v1100_v37 = vld [vmem:[%s1333_s26 + $0xc] sm:$0xf]  ;;  %v1207_v62 = vpack.c.bf16 %v254_v34, %v254_v34  ;;  %v1208_v63 = vpack.c.bf16 %v255_v35, %v255_v35 }
  0x1e   : > { %233 = vst.msk [vmem:[%s1333_s26 + $0x9c] sm:$0xf] %vm192_vm0, %v1285_v2  ;;  %234 = vst.msk [vmem:[%s1333_s26 + $0xa0] sm:$0xf] %vm192_vm0, %v1285_v2  ;;  %v386_v38 = vrot.slane %v382_v24, 4  ;;  %v395_v40 = vrot.slane %v390_v26, 4  ;;  %v704_v48 = vsel %vm1456_vm7, %v385_v36, %v1100_v37 }
  0x1f   : > { %236 = vst.msk [vmem:[%s1333_s26 + $0xa8] sm:$0xf] %vm192_vm0, %v1285_v2  ;;  %237 = vst.msk [vmem:[%s1333_s26 + $0xac] sm:$0xf] %vm192_vm0, %v1285_v2  ;;  %v1105_v43 = vld [vmem:[%s1333_s26 + $0x18] sm:$0xf] }
  0x20   : > { %239 = vst.msk [vmem:[%s1333_s26 + $0xb4] sm:$0xf] %vm192_vm0, %v1285_v2  ;;  %240 = vst.msk [vmem:[%s1333_s26 + $0xb8] sm:$0xf] %vm192_vm0, %v1285_v2  ;;  %v403_v44 = vrot.slane %v399_v30, 4  ;;  %v412_v46 = vrot.slane %v407_v31, 4  ;;  %v394_v49 = vsel %vm1461_vm8, %v386_v38, %v393_v39  ;;  %v714_v54 = vsel %vm1456_vm7, %v402_v42, %v1105_v43 }
  0x21   : > { %242 = vst.msk [vmem:[%s1333_s26 + $0xc0] sm:$0xf] %vm192_vm0, %v1285_v2  ;;  %243 = vst.msk [vmem:[%s1333_s26 + $0xc4] sm:$0xf] %vm192_vm0, %v1285_v2  ;;  %v416_v51 = vrot.slane %v414_v27, 7  ;;  %v256_v52 = vld [vmem:[%s1338_s29 + $0x40] sm:$0xff] }
  0x22   : > { %245 = vst.msk [vmem:[%s1333_s26 + $0xcc] sm:$0xf] %vm192_vm0, %v1285_v2  ;;  %246 = vst.msk [vmem:[%s1333_s26 + $0xd0] sm:$0xf] %vm192_vm0, %v1285_v2  ;;  %v257_v53 = vld [vmem:[%s1338_s29 + $0x48] sm:$0xff]  ;;  %v411_v55 = vsel %vm1461_vm8, %v403_v44, %v410_v45  ;;  %v424_v58 = vrot.slane %v422_v32, 7  ;;  %v1209_v4 = vpack.c.bf16 %v256_v52, %v256_v52 }
  0x23   : > { %199 = vst.msk [vmem:[%s1333_s26 + $0x14] sm:$0x1] %vm195_vm1, %v1285_v2  ;;  %196 = vst.msk [vmem:[%s1333_s26 + $0x8] sm:$0x1] %vm195_vm1, %v1285_v2  ;;  %v1110_v57 = vld [vmem:[%s1333_s26 + $0x24] sm:$0xf]  ;;  %v419_v59 = vor.u32 %v417_v28, %v416_v51  ;;  %v1210_v5 = vpack.c.bf16 %v257_v53, %v257_v53 }
  0x24   : > { %202 = vst.msk [vmem:[%s1333_s26 + $0x20] sm:$0x1] %vm195_vm1, %v1285_v2  ;;  %205 = vst.msk [vmem:[%s1333_s26 + $0x2c] sm:$0x1] %vm195_vm1, %v1285_v2  ;;  %v420_v60 = vrot.slane %v416_v51, 4  ;;  %v429_v3 = vrot.slane %v424_v58, 4 }
  0x25   : > { %208 = vst.msk [vmem:[%s1333_s26 + $0x38] sm:$0x1] %vm195_vm1, %v1285_v2  ;;  %211 = vst.msk [vmem:[%s1333_s26 + $0x44] sm:$0x1] %vm195_vm1, %v1285_v2  ;;  %v721_v6 = vsel %vm1456_vm7, %v419_v59, %v1110_v57  ;;  %v431_v7 = vshrl.u32 %v1207_v62, 16  ;;  %v434_v8 = vshll.u32 %v1207_v62, 16 }
  0x26   : > { %214 = vst.msk [vmem:[%s1333_s26 + $0x50] sm:$0x1] %vm195_vm1, %v1285_v2  ;;  %217 = vst.msk [vmem:[%s1333_s26 + $0x5c] sm:$0x1] %vm195_vm1, %v1285_v2  ;;  %v439_v9 = vshrl.u32 %v1208_v63, 16  ;;  %v258_v10 = vld [vmem:[%s1338_s29 + $0x50] sm:$0xff] }
  0x27   : > { %220 = vst.msk [vmem:[%s1333_s26 + $0x68] sm:$0x1] %vm195_vm1, %v1285_v2  ;;  %223 = vst.msk [vmem:[%s1333_s26 + $0x74] sm:$0x1] %vm195_vm1, %v1285_v2  ;;  %v259_v11 = vld [vmem:[%s1338_s29 + $0x58] sm:$0xff]  ;;  %v442_v14 = vshll.u32 %v1208_v63, 16  ;;  %v1211_v26 = vpack.c.bf16 %v258_v10, %v258_v10 }
  0x28   : > { %226 = vst.msk [vmem:[%s1333_s26 + $0x80] sm:$0x1] %vm195_vm1, %v1285_v2  ;;  %229 = vst.msk [vmem:[%s1333_s26 + $0x8c] sm:$0x1] %vm195_vm1, %v1285_v2  ;;  %v448_v15 = vshrl.u32 %v1209_v4, 16  ;;  %v433_v16 = vrot.slane %v431_v7, 7  ;;  %v1212_v27 = vpack.c.bf16 %v259_v11, %v259_v11 }
  0x29   : > { %232 = vst.msk [vmem:[%s1333_s26 + $0x98] sm:$0x1] %vm195_vm1, %v1285_v2  ;;  %235 = vst.msk [vmem:[%s1333_s26 + $0xa4] sm:$0x1] %vm195_vm1, %v1285_v2  ;;  %v441_v17 = vrot.slane %v439_v9, 7  ;;  %v451_v18 = vshll.u32 %v1209_v4, 16 }
  0x2a   : > { %238 = vst.msk [vmem:[%s1333_s26 + $0xb0] sm:$0x1] %vm195_vm1, %v1285_v2  ;;  %241 = vst.msk [vmem:[%s1333_s26 + $0xbc] sm:$0x1] %vm195_vm1, %v1285_v2  ;;  %v1103_v41 = vld [vmem:[%s1333_s26 + $0x14] sm:$0x1]  ;;  %v436_v28 = vor.u32 %v434_v8, %v433_v16 }
  0x2b   : > { %244 = vst.msk [vmem:[%s1333_s26 + $0xc8] sm:$0x1] %vm195_vm1, %v1285_v2  ;;  %247 = vst.msk [vmem:[%s1333_s26 + $0xd4] sm:$0x1] %vm195_vm1, %v1285_v2  ;;  %v1108_v47 = vld [vmem:[%s1333_s26 + $0x20] sm:$0x1]  ;;  %v711_v50 = vsel %vm1467_vm9, %v395_v40, %v1103_v41  ;;  %v427_v2 = vor.u32 %v425_v33, %v424_v58  ;;  %v444_v31 = vor.u32 %v442_v14, %v441_v17 }
  0x2c   : > { %1101 = vst [vmem:[%s1333_s26 + $0xc] sm:$0xf] %v704_v48  ;;  %1102 = vst.msk [vmem:[%s1333_s26 + $0x10] sm:$0xf] %vm700_vm3, %v394_v49  ;;  %v718_v56 = vsel %vm1467_vm9, %v412_v46, %v1108_v47  ;;  %v1113_v61 = vld [vmem:[%s1333_s26 + $0x2c] sm:$0x1] }
  0x2d   : > { %1104 = vst [vmem:[%s1333_s26 + $0x14] sm:$0x1] %v711_v50  ;;  %1106 = vst [vmem:[%s1333_s26 + $0x18] sm:$0xf] %v714_v54  ;;  %v428_v12 = vsel %vm1461_vm8, %v420_v60, %v427_v2  ;;  %v725_v13 = vsel %vm1467_vm9, %v429_v3, %v1113_v61  ;;  %v456_v20 = vshrl.u32 %v1210_v5, 16  ;;  %v450_v23 = vrot.slane %v448_v15, 7 }
  0x2e   : > { %1107 = vst.msk [vmem:[%s1333_s26 + $0x1c] sm:$0xf] %vm700_vm3, %v411_v55  ;;  %1109 = vst [vmem:[%s1333_s26 + $0x20] sm:$0x1] %v718_v56  ;;  %v1115_v21 = vld [vmem:[%s1333_s26 + $0x30] sm:$0xf] }
  0x2f   : > { %1111 = vst [vmem:[%s1333_s26 + $0x24] sm:$0xf] %v721_v6  ;;  %1112 = vst.msk [vmem:[%s1333_s26 + $0x28] sm:$0xf] %vm700_vm3, %v428_v12  ;;  %v1118_v22 = vld [vmem:[%s1333_s26 + $0x38] sm:$0x1]  ;;  %v453_v34 = vor.u32 %v451_v18, %v450_v23  ;;  %v728_v40 = vsel %vm1456_vm7, %v436_v28, %v1115_v21 }
  0x30   : > { %1114 = vst [vmem:[%s1333_s26 + $0x2c] sm:$0x1] %v725_v13  ;;  %v459_v24 = vshll.u32 %v1210_v5, 16  ;;  %v437_v30 = vrot.slane %v433_v16, 4  ;;  %v446_v32 = vrot.slane %v441_v17, 4  ;;  %v454_v35 = vrot.slane %v450_v23, 4 }
  0x31   : > { %v1120_v33 = vld [vmem:[%s1333_s26 + $0x3c] sm:$0xf]  ;;  %v458_v36 = vrot.slane %v456_v20, 7  ;;  %v465_v37 = vshrl.u32 %v1211_v26, 16  ;;  %v260_v38 = vld [vmem:[%s1338_s29 + $0x60] sm:$0xff]  ;;  %v261_v39 = vld [vmem:[%s1338_s29 + $0x68] sm:$0xff] }
  0x32   : > { %v445_v41 = vsel %vm1461_vm8, %v437_v30, %v444_v31  ;;  %v732_v42 = vsel %vm1467_vm9, %v446_v32, %v1118_v22  ;;  %v1123_v43 = vld [vmem:[%s1333_s26 + $0x44] sm:$0x1]  ;;  %v468_v44 = vshll.u32 %v1211_v26, 16  ;;  %1116 = vst [vmem:[%s1333_s26 + $0x30] sm:$0xf] %v728_v40  ;;  %v735_v45 = vsel %vm1456_vm7, %v453_v34, %v1120_v33  ;;  %v262_v54 = vld [vmem:[%s1338_s29 + $0x70] sm:$0xff] }
  0x33   : > { %1117 = vst.msk [vmem:[%s1333_s26 + $0x34] sm:$0xf] %vm700_vm3, %v445_v41  ;;  %1119 = vst [vmem:[%s1333_s26 + $0x38] sm:$0x1] %v732_v42  ;;  %v461_v46 = vor.u32 %v459_v24, %v458_v36  ;;  %v463_v47 = vrot.slane %v458_v36, 4  ;;  %v467_v48 = vrot.slane %v465_v37, 7  ;;  %v1213_v52 = vpack.c.bf16 %v260_v38, %v260_v38 }
  0x34   : > { %1121 = vst [vmem:[%s1333_s26 + $0x3c] sm:$0xf] %v735_v45  ;;  %v1125_v49 = vld [vmem:[%s1333_s26 + $0x48] sm:$0xf]  ;;  %v473_v50 = vshrl.u32 %v1212_v27, 16  ;;  %v476_v51 = vshll.u32 %v1212_v27, 16  ;;  %v1214_v53 = vpack.c.bf16 %v261_v39, %v261_v39  ;;  %v1215_v5 = vpack.c.bf16 %v262_v54, %v262_v54 }
  0x35   : > { %v263_v55 = vld [vmem:[%s1338_s29 + $0x78] sm:$0xff]  ;;  %v462_v56 = vsel %vm1461_vm8, %v454_v35, %v461_v46  ;;  %v739_v57 = vsel %vm1467_vm9, %v463_v47, %v1123_v43  ;;  %v470_v58 = vor.u32 %v468_v44, %v467_v48  ;;  %v471_v59 = vrot.slane %v467_v48, 4  ;;  %v1128_v3 = vld [vmem:[%s1333_s26 + $0x50] sm:$0x1]  ;;  %v264_v11 = vld [vmem:[%s1338_s29 + $0x80] sm:$0xff] }
  0x36   : > { %1122 = vst.msk [vmem:[%s1333_s26 + $0x40] sm:$0xf] %vm700_vm3, %v462_v56  ;;  %1124 = vst [vmem:[%s1333_s26 + $0x44] sm:$0x1] %v739_v57  ;;  %v475_v60 = vrot.slane %v473_v50, 7  ;;  %v482_v61 = vshrl.u32 %v1213_v52, 16  ;;  %v1216_v6 = vpack.c.bf16 %v263_v55, %v263_v55  ;;  %v1217_v33 = vpack.c.bf16 %v264_v11, %v264_v11 }
  0x37   : > { %v485_v62 = vshll.u32 %v1213_v52, 16  ;;  %v490_v63 = vshrl.u32 %v1214_v53, 16  ;;  %v742_v2 = vsel %vm1456_vm7, %v470_v58, %v1125_v49  ;;  %v493_v4 = vshll.u32 %v1214_v53, 16  ;;  %v265_v12 = vld [vmem:[%s1338_s29 + $0x88] sm:$0xff]  ;;  %v266_v13 = vld [vmem:[%s1338_s29 + $0x90] sm:$0xff]  ;;  %v267_v45 = vld [vmem:[%s1338_s29 + $0x98] sm:$0xff] }
  0x38   : > { %1126 = vst [vmem:[%s1333_s26 + $0x48] sm:$0xf] %v742_v2  ;;  %v478_v7 = vor.u32 %v476_v51, %v475_v60  ;;  %v480_v8 = vrot.slane %v475_v60, 4  ;;  %v484_v9 = vrot.slane %v482_v61, 7  ;;  %v1130_v14 = vld [vmem:[%s1333_s26 + $0x54] sm:$0xf]  ;;  %v1218_v34 = vpack.c.bf16 %v265_v12, %v265_v12 }
  0x39   : > { %v492_v10 = vrot.slane %v490_v63, 7  ;;  %v499_v15 = vshrl.u32 %v1215_v5, 16  ;;  %v502_v16 = vshll.u32 %v1215_v5, 16  ;;  %v507_v17 = vshrl.u32 %v1216_v6, 16  ;;  %v1133_v24 = vld [vmem:[%s1333_s26 + $0x5c] sm:$0x1] }
  0x3a   : > { %v510_v18 = vshll.u32 %v1216_v6, 16  ;;  %v479_v20 = vsel %vm1461_vm8, %v471_v59, %v478_v7  ;;  %v746_v21 = vsel %vm1467_vm9, %v480_v8, %v1128_v3  ;;  %v487_v22 = vor.u32 %v485_v62, %v484_v9  ;;  %v1135_v32 = vld [vmem:[%s1333_s26 + $0x60] sm:$0xf]  ;;  %v1138_v40 = vld [vmem:[%s1333_s26 + $0x68] sm:$0x1]  ;;  %v270_v52 = vld [vmem:[%s1338_s29 + $0xb0] sm:$0xff] }
  0x3b   : > { %v488_v23 = vrot.slane %v484_v9, 4  ;;  %1127 = vst.msk [vmem:[%s1333_s26 + $0x4c] sm:$0xf] %vm700_vm3, %v479_v20  ;;  %1129 = vst [vmem:[%s1333_s26 + $0x50] sm:$0x1] %v746_v21  ;;  %v495_v26 = vor.u32 %v493_v4, %v492_v10  ;;  %v497_v27 = vrot.slane %v492_v10, 4  ;;  %v1219_v35 = vpack.c.bf16 %v266_v13, %v266_v13 }
  0x3c   : > { %v501_v28 = vrot.slane %v499_v15, 7  ;;  %v509_v30 = vrot.slane %v507_v17, 7  ;;  %v749_v31 = vsel %vm1456_vm7, %v487_v22, %v1130_v14  ;;  %v516_v43 = vshrl.u32 %v1217_v33, 16  ;;  %v268_v46 = vld [vmem:[%s1338_s29 + $0xa0] sm:$0xff]  ;;  %v269_v51 = vld [vmem:[%s1338_s29 + $0xa8] sm:$0xff]  ;;  %v271_v14 = vld [vmem:[%s1338_s29 + $0xb8] sm:$0xff] }
  0x3d   : > { %1131 = vst [vmem:[%s1333_s26 + $0x54] sm:$0xf] %v749_v31  ;;  %v496_v36 = vsel %vm1461_vm8, %v488_v23, %v495_v26  ;;  %v753_v37 = vsel %vm1467_vm9, %v497_v27, %v1133_v24  ;;  %v519_v44 = vshll.u32 %v1217_v33, 16  ;;  %v524_v48 = vshrl.u32 %v1218_v34, 16  ;;  %v1140_v57 = vld [vmem:[%s1333_s26 + $0x6c] sm:$0xf] }
  0x3e   : > { %v504_v38 = vor.u32 %v502_v16, %v501_v28  ;;  %v505_v39 = vrot.slane %v501_v28, 4  ;;  %1132 = vst.msk [vmem:[%s1333_s26 + $0x58] sm:$0xf] %vm700_vm3, %v496_v36  ;;  %1134 = vst [vmem:[%s1333_s26 + $0x5c] sm:$0x1] %v753_v37  ;;  %v512_v41 = vor.u32 %v510_v18, %v509_v30  ;;  %v514_v42 = vrot.slane %v509_v30, 4 }
  0x3f   : > { %v527_v49 = vshll.u32 %v1218_v34, 16  ;;  %v533_v50 = vshrl.u32 %v1219_v35, 16  ;;  %v518_v55 = vrot.slane %v516_v43, 7  ;;  %v536_v56 = vshll.u32 %v1219_v35, 16  ;;  %v1143_v2 = vld [vmem:[%s1333_s26 + $0x74] sm:$0x1] }
  0x40   : > { %v756_v47 = vsel %vm1456_vm7, %v504_v38, %v1135_v32  ;;  %v513_v53 = vsel %vm1461_vm8, %v505_v39, %v512_v41  ;;  %v760_v54 = vsel %vm1467_vm9, %v514_v42, %v1138_v40  ;;  %v526_v58 = vrot.slane %v524_v48, 7  ;;  %v1145_v3 = vld [vmem:[%s1333_s26 + $0x78] sm:$0xf]  ;;  %v272_v15 = vld [vmem:[%s1338_s29 + $0xc0] sm:$0xff]  ;;  %v273_v41 = vld [vmem:[%s1338_s29 + $0xc8] sm:$0xff] }
  0x41   : > { %1136 = vst [vmem:[%s1333_s26 + $0x60] sm:$0xf] %v756_v47  ;;  %1137 = vst.msk [vmem:[%s1333_s26 + $0x64] sm:$0xf] %vm700_vm3, %v513_v53  ;;  %v535_v59 = vrot.slane %v533_v50, 7  ;;  %v1220_v60 = vpack.c.bf16 %v267_v45, %v267_v45  ;;  %v1221_v61 = vpack.c.bf16 %v268_v46, %v268_v46  ;;  %v521_v62 = vor.u32 %v519_v44, %v518_v55  ;;  %v274_v48 = vld [vmem:[%s1338_s29 + $0xd0] sm:$0xff] }
  0x42   : > { %1139 = vst [vmem:[%s1333_s26 + $0x68] sm:$0x1] %v760_v54  ;;  %v522_v63 = vrot.slane %v518_v55, 4  ;;  %v1222_v4 = vpack.c.bf16 %v269_v51, %v269_v51  ;;  %v1223_v5 = vpack.c.bf16 %v270_v52, %v270_v52  ;;  %v529_v6 = vor.u32 %v527_v49, %v526_v58  ;;  %v1148_v26 = vld [vmem:[%s1333_s26 + $0x80] sm:$0x1] }
  0x43   : > { %v531_v7 = vrot.slane %v526_v58, 4  ;;  %v538_v8 = vor.u32 %v536_v56, %v535_v59  ;;  %v539_v9 = vrot.slane %v535_v59, 4  ;;  %v763_v10 = vsel %vm1456_vm7, %v521_v62, %v1140_v57  ;;  %v1150_v27 = vld [vmem:[%s1333_s26 + $0x84] sm:$0xf]  ;;  %v1153_v45 = vld [vmem:[%s1333_s26 + $0x8c] sm:$0x1] }
  0x44   : > { %v541_v11 = vshrl.u32 %v1220_v60, 16  ;;  %v544_v12 = vshll.u32 %v1220_v60, 16  ;;  %v550_v13 = vshrl.u32 %v1221_v61, 16  ;;  %1141 = vst [vmem:[%s1333_s26 + $0x6c] sm:$0xf] %v763_v10  ;;  %v530_v16 = vsel %vm1461_vm8, %v522_v63, %v529_v6  ;;  %v275_v63 = vld [vmem:[%s1338_s29 + $0xd8] sm:$0xff] }
  0x45   : > { %v767_v17 = vsel %vm1467_vm9, %v531_v7, %v1143_v2  ;;  %v770_v18 = vsel %vm1456_vm7, %v538_v8, %v1145_v3  ;;  %v553_v20 = vshll.u32 %v1221_v61, 16  ;;  %1142 = vst.msk [vmem:[%s1333_s26 + $0x70] sm:$0xf] %vm700_vm3, %v530_v16  ;;  %v558_v23 = vshrl.u32 %v1222_v4, 16  ;;  %v1155_v46 = vld [vmem:[%s1333_s26 + $0x90] sm:$0xf] }
  0x46   : > { %1144 = vst [vmem:[%s1333_s26 + $0x74] sm:$0x1] %v767_v17  ;;  %1146 = vst [vmem:[%s1333_s26 + $0x78] sm:$0xf] %v770_v18  ;;  %v543_v21 = vrot.slane %v541_v11, 7  ;;  %v552_v22 = vrot.slane %v550_v13, 7  ;;  %v1224_v31 = vpack.c.bf16 %v271_v14, %v271_v14  ;;  %v1225_v32 = vpack.c.bf16 %v272_v15, %v272_v15 }
  0x47   : > { %v561_v24 = vshll.u32 %v1222_v4, 16  ;;  %v567_v28 = vshrl.u32 %v1223_v5, 16  ;;  %v570_v30 = vshll.u32 %v1223_v5, 16  ;;  %v560_v37 = vrot.slane %v558_v23, 7  ;;  %v1158_v60 = vld [vmem:[%s1333_s26 + $0x98] sm:$0x1] }
  0x48   : > { %v546_v33 = vor.u32 %v544_v12, %v543_v21  ;;  %v548_v34 = vrot.slane %v543_v21, 4  ;;  %v555_v35 = vor.u32 %v553_v20, %v552_v22  ;;  %v556_v36 = vrot.slane %v552_v22, 4  ;;  %v1160_v61 = vld [vmem:[%s1333_s26 + $0x9c] sm:$0xf]  ;;  %v276_v6 = vld [vmem:[%s1338_s29 + $0xe0] sm:$0xff]  ;;  %v277_v7 = vld [vmem:[%s1338_s29 + $0xe8] sm:$0xff] }
  0x49   : > { %v569_v38 = vrot.slane %v567_v28, 7  ;;  %v575_v39 = vshrl.u32 %v1224_v31, 16  ;;  %v578_v40 = vshll.u32 %v1224_v31, 16  ;;  %v584_v47 = vshrl.u32 %v1225_v32, 16  ;;  %v278_v12 = vld [vmem:[%s1338_s29 + $0xf0] sm:$0xff]  ;;  %v279_v13 = vld [vmem:[%s1338_s29 + $0xf8] sm:$0xff] }
  0x4a   : > { %v547_v42 = vsel %vm1461_vm8, %v539_v9, %v546_v33  ;;  %v774_v43 = vsel %vm1467_vm9, %v548_v34, %v1148_v26  ;;  %v777_v44 = vsel %vm1456_vm7, %v555_v35, %v1150_v27  ;;  %v563_v49 = vor.u32 %v561_v24, %v560_v37  ;;  %v1163_v23 = vld [vmem:[%s1333_s26 + $0xa4] sm:$0x1]  ;;  %v1165_v24 = vld [vmem:[%s1333_s26 + $0xa8] sm:$0xf] }
  0x4b   : > { %1147 = vst.msk [vmem:[%s1333_s26 + $0x7c] sm:$0xf] %vm700_vm3, %v547_v42  ;;  %1149 = vst [vmem:[%s1333_s26 + $0x80] sm:$0x1] %v774_v43  ;;  %v565_v50 = vrot.slane %v560_v37, 4  ;;  %v572_v51 = vor.u32 %v570_v30, %v569_v38  ;;  %v573_v52 = vrot.slane %v569_v38, 4  ;;  %v1226_v56 = vpack.c.bf16 %v273_v41, %v273_v41 }
  0x4c   : > { %1151 = vst [vmem:[%s1333_s26 + $0x84] sm:$0xf] %v777_v44  ;;  %v577_v53 = vrot.slane %v575_v39, 7  ;;  %v586_v54 = vrot.slane %v584_v47, 7  ;;  %v587_v55 = vshll.u32 %v1225_v32, 16  ;;  %v564_v57 = vsel %vm1461_vm8, %v556_v36, %v563_v49 }
  0x4d   : > { %v781_v58 = vsel %vm1467_vm9, %v565_v50, %v1153_v45  ;;  %v784_v59 = vsel %vm1456_vm7, %v572_v51, %v1155_v46  ;;  %v1227_v62 = vpack.c.bf16 %v274_v48, %v274_v48  ;;  %1152 = vst.msk [vmem:[%s1333_s26 + $0x88] sm:$0xf] %vm700_vm3, %v564_v57  ;;  %v592_v8 = vshrl.u32 %v1226_v56, 16  ;;  %v1168_v42 = vld [vmem:[%s1333_s26 + $0xb0] sm:$0x1] }
  0x4e   : > { %1154 = vst [vmem:[%s1333_s26 + $0x8c] sm:$0x1] %v781_v58  ;;  %1156 = vst [vmem:[%s1333_s26 + $0x90] sm:$0xf] %v784_v59  ;;  %v580_v2 = vor.u32 %v578_v40, %v577_v53  ;;  %v582_v3 = vrot.slane %v577_v53, 4  ;;  %v589_v4 = vor.u32 %v587_v55, %v586_v54  ;;  %v590_v5 = vrot.slane %v586_v54, 4 }
  0x4f   : > { %v595_v9 = vshll.u32 %v1226_v56, 16  ;;  %v601_v10 = vshrl.u32 %v1227_v62, 16  ;;  %v604_v11 = vshll.u32 %v1227_v62, 16  ;;  %v1228_v17 = vpack.c.bf16 %v275_v63, %v275_v63  ;;  %v1170_v48 = vld [vmem:[%s1333_s26 + $0xb4] sm:$0xf] }
  0x50   : > { %v581_v14 = vsel %vm1461_vm8, %v573_v52, %v580_v2  ;;  %v788_v15 = vsel %vm1467_vm9, %v582_v3, %v1158_v60  ;;  %v791_v16 = vsel %vm1456_vm7, %v589_v4, %v1160_v61  ;;  %v594_v18 = vrot.slane %v592_v8, 7  ;;  %v1173_v57 = vld [vmem:[%s1333_s26 + $0xbc] sm:$0x1]  ;;  %v1175_v63 = vld [vmem:[%s1333_s26 + $0xc0] sm:$0xf] }
  0x51   : > { %1157 = vst.msk [vmem:[%s1333_s26 + $0x94] sm:$0xf] %vm700_vm3, %v581_v14  ;;  %1159 = vst [vmem:[%s1333_s26 + $0x98] sm:$0x1] %v788_v15  ;;  %v603_v20 = vrot.slane %v601_v10, 7  ;;  %v1229_v21 = vpack.c.bf16 %v276_v6, %v276_v6  ;;  %v1230_v22 = vpack.c.bf16 %v277_v7, %v277_v7  ;;  %v609_v26 = vshrl.u32 %v1228_v17, 16 }
  0x52   : > { %1161 = vst [vmem:[%s1333_s26 + $0x9c] sm:$0xf] %v791_v16  ;;  %v612_v27 = vshll.u32 %v1228_v17, 16  ;;  %v1231_v28 = vpack.c.bf16 %v278_v12, %v278_v12  ;;  %v1232_v30 = vpack.c.bf16 %v279_v13, %v279_v13  ;;  %v597_v31 = vor.u32 %v595_v9, %v594_v18  ;;  %v1178_v6 = vld [vmem:[%s1333_s26 + $0xc8] sm:$0x1] }
  0x53   : > { %v599_v32 = vrot.slane %v594_v18, 4  ;;  %v606_v33 = vor.u32 %v604_v11, %v603_v20  ;;  %v607_v34 = vrot.slane %v603_v20, 4  ;;  %v611_v35 = vrot.slane %v609_v26, 7 }
  0x54   : > { %v618_v36 = vshrl.u32 %v1229_v21, 16  ;;  %v621_v37 = vshll.u32 %v1229_v21, 16  ;;  %v626_v38 = vshrl.u32 %v1230_v22, 16  ;;  %v598_v39 = vsel %vm1461_vm8, %v590_v5, %v597_v31 }
  0x55   : > { %v795_v40 = vsel %vm1467_vm9, %v599_v32, %v1163_v23  ;;  %v798_v41 = vsel %vm1456_vm7, %v606_v33, %v1165_v24  ;;  %v629_v43 = vshll.u32 %v1230_v22, 16  ;;  %1162 = vst.msk [vmem:[%s1333_s26 + $0xa0] sm:$0xf] %vm700_vm3, %v598_v39  ;;  %v614_v44 = vor.u32 %v612_v27, %v611_v35 }
  0x56   : > { %1164 = vst [vmem:[%s1333_s26 + $0xa4] sm:$0x1] %v795_v40  ;;  %1166 = vst [vmem:[%s1333_s26 + $0xa8] sm:$0xf] %v798_v41  ;;  %v616_v45 = vrot.slane %v611_v35, 4  ;;  %v620_v46 = vrot.slane %v618_v36, 7 }
  0x57   : > { %v628_v47 = vrot.slane %v626_v38, 7  ;;  %v635_v49 = vshrl.u32 %v1231_v28, 16  ;;  %v638_v50 = vshll.u32 %v1231_v28, 16  ;;  %v643_v51 = vshrl.u32 %v1232_v30, 16 }
  0x58   : > { %v646_v52 = vshll.u32 %v1232_v30, 16  ;;  %v615_v53 = vsel %vm1461_vm8, %v607_v34, %v614_v44  ;;  %v802_v54 = vsel %vm1467_vm9, %v616_v45, %v1168_v42  ;;  %v623_v55 = vor.u32 %v621_v37, %v620_v46 }
  0x59   : > { %v624_v56 = vrot.slane %v620_v46, 4  ;;  %1167 = vst.msk [vmem:[%s1333_s26 + $0xac] sm:$0xf] %vm700_vm3, %v615_v53  ;;  %1169 = vst [vmem:[%s1333_s26 + $0xb0] sm:$0x1] %v802_v54  ;;  %v631_v58 = vor.u32 %v629_v43, %v628_v47  ;;  %v633_v59 = vrot.slane %v628_v47, 4 }
  0x5a   : > { %v637_v60 = vrot.slane %v635_v49, 7  ;;  %v645_v61 = vrot.slane %v643_v51, 7  ;;  %v805_v62 = vsel %vm1456_vm7, %v623_v55, %v1170_v48 }
  0x5b   : > { %1171 = vst [vmem:[%s1333_s26 + $0xb4] sm:$0xf] %v805_v62  ;;  %v632_v2 = vsel %vm1461_vm8, %v624_v56, %v631_v58  ;;  %v809_v3 = vsel %vm1467_vm9, %v633_v59, %v1173_v57 }
  0x5c   : > { %v640_v4 = vor.u32 %v638_v50, %v637_v60  ;;  %v641_v5 = vrot.slane %v637_v60, 4  ;;  %1172 = vst.msk [vmem:[%s1333_s26 + $0xb8] sm:$0xf] %vm700_vm3, %v632_v2  ;;  %1174 = vst [vmem:[%s1333_s26 + $0xbc] sm:$0x1] %v809_v3  ;;  %v648_v7 = vor.u32 %v646_v52, %v645_v61  ;;  %v650_v8 = vrot.slane %v645_v61, 4 }
  0x5e   : > { %v812_v9 = vsel %vm1456_vm7, %v640_v4, %v1175_v63  ;;  %v649_v10 = vsel %vm1461_vm8, %v641_v5, %v648_v7  ;;  %v816_v11 = vsel %vm1467_vm9, %v650_v8, %v1178_v6 }
  0x5f   : > { %1176 = vst [vmem:[%s1333_s26 + $0xc0] sm:$0xf] %v812_v9  ;;  %1177 = vst.msk [vmem:[%s1333_s26 + $0xc4] sm:$0xf] %vm700_vm3, %v649_v10 }
  0x60   : > { %1179 = vst [vmem:[%s1333_s26 + $0xc8] sm:$0x1] %v816_v11 }
  0x61 LB: >> { %vm848_vm10 = vcmask 64512   ;;  %s826_s4 = scvt.s32.f32 %s1283_s30  ;;  %s1286_s15 = smov 4   ;;  %vm966_vm11 = vcmask 93216   ;;  %vm973_vm13 = vcmask 90144   ;;  %s1283_s30 = sphi %s1689_s30, %s825_s30  }
  0x62   : >> { %1242 = vmatprep.mubr.msk.f32.mxu0 %vm848_vm10, %v1318_v0  ;;  %s1020_s16 = smul.u32 12, %s1283_s30  ;;  %vm967_vm12 = vmand %vm966_vm11, %vm701_vm2  ;;  %s825_s30 = sadd.s32 1, %s1283_s30  }
  0x63   : >> { %s827_s5 = smul.f32 0.46666667, %s826_s4  ;;  %vm974_vm14 = vmand %vm973_vm13, %vm376_vm4  ;;  %p822_p7 = scmp.ge.s32.totalorder %s825_s30, 16  }
  0x64   : >> { %s1021_s17 = scalar_lea.vmem %s1333_s26, %s1020_s16 }
  0x65   : >> { %p1246_p4 = scmp.lt.s32.totalorder %s827_s5, 0  ;;  %s1247_s6 = sceil.f32 %s827_s5 }
  0x66   : >> { %s1248_s7 = sfloor.f32 %s827_s5 }
  0x67   : >> { %s1725_s6 = smov (!%p1246_p4, %s1247_s6), %s1248_s7  ;;  %v1192_v35 = vld [vmem:[%s1021_s17 + $0xc] sm:$0xf]  ;;  %v1195_v39 = vld [vmem:[%s1021_s17 + $0x14] sm:$0x1] }
  0x68   : >> { %s1250_s8 = scvt.f32.s32 %s1725_s6 }
  0x6a   : >> { %p829_p5 = scmp.gt.s32.totalorder %s1250_s8, 0  ;;  %p1180_p6 = scmp.lt.s32.totalorder %s1250_s8, 6 }
  0x6c   : >> { %s1727_s8 = smov (!%p829_p5, %s1250_s8), 0 }
  0x6d   : >> { %s1729_s8 = smov (!%p1180_p6, %s1727_s8), 6 }
  0x6e   : >> { %s833_s9 = scvt.s32.f32 %s1729_s8  ;;  %s1185_s10 = sshll.u32 %s1729_s8, 3 }
  0x6f   : >> { %s836_s11 = scalar_lea.vmem %s1328_s22, %s1185_s10 }
  0x70   : >> { %s834_s13 = ssub.f32 %s827_s5, %s833_s9  ;;  %v1187_v19 = vld [vmem:[%s836_s11 + $0x8] sm:$0xff]  ;;  %v837_v29 = vld [vmem:[%s836_s11] sm:$0xff] }
  0x72   : >> { %s842_s14 = ssub.f32 1.0, %s834_s13  ;;  %v845_v12 = vstv %s834_s13 }
  0x73   : >> { %v846_v13 = vmul.f32 %v1187_v19, %v845_v12 }
  0x74   : >> { %v843_v14 = vstv %s842_s14 }
  0x75   : >> { %v844_v15 = vmul.f32 %v843_v14, %v837_v29 }
  0x77   : >> { %v847_v16 = vadd.f32 %v846_v13, %v844_v15 }
  0x79   : >> { %1240 = vmatprep.subr.mxu0 %v847_v16 }
  0x7a   : >> { %1241 = vmatpush3.msra.mxu0 %v847_v16 }
  0x7b   : >> { %1243 = vmatmul.mubr.msk.f32.vlgmr.msra.gmra.mrb[0].mxu0 %vm848_vm10, %v1323_v1 }
 0x14e   : >> { %v1244_v17 = vpop.f32.mrb[0].mxu0 }
 0x14f   : >> { %v1236_v18 = vpack.c.bf16 %v1244_v17, %v1244_v17  ;;  %v921_v20 = vpop.f32.mrb[1].mxu0 }
 0x150   : >> { %v1235_v21 = vpack.c.bf16 %v921_v20, %v921_v20 }
 0x151   : >> { %v946_v22 = vshrl.u32 %v1236_v18, 16  ;;  %v949_v26 = vshll.u32 %v1236_v18, 16 }
 0x152   : >> { %v938_v23 = vshrl.u32 %v1235_v21, 16  ;;  %v941_v28 = vshll.u32 %v1235_v21, 16 }
 0x153   : >> { %v948_v24 = vrot.slane %v946_v22, 7 }
 0x154   : >> { %v940_v27 = vrot.slane %v938_v23, 7 }
 0x155   : >> { %v951_v30 = vor.u32 %v949_v26, %v948_v24  ;;  %v953_v34 = vrot.slane %v948_v24, 4 }
 0x156   : >> { %v943_v31 = vor.u32 %v941_v28, %v940_v27  ;;  %v944_v32 = vrot.slane %v940_v27, 4 }
 0x158   : >> { %954 = vrot.lane.b32.xlu0 %v943_v31, %s1286_s15  ;;  %v952_v33 = vsel %vm1461_vm8, %v944_v32, %v951_v30 }
 0x159   : >> { %956 = vrot.lane.b32.xlu1 %v952_v33, %s1286_s15 }
 0x15c   : >> { %958 = vrot.lane.b32.xlu0 %v953_v34, %s1286_s15 }
 0x1ca   : >> { %v955_v36 = vpop.permute.xlu0 %954  ;;  %824 = sbr.rel (!%p822_p7) target bundleno = 97 (0x61), region = 76 }
 0x1cb   : >> { %v969_v37 = vsel %vm967_vm12, %v955_v36, %v1192_v35  ;;  %v957_v38 = vpop.permute.xlu1 %956 }
 0x1cc   : >> { %1193 = vst [vmem:[%s1021_s17 + $0xc] sm:$0xf] %v969_v37  ;;  %1194 = vst.msk [vmem:[%s1021_s17 + $0x10] sm:$0xf] %vm966_vm11, %v957_v38 }
 0x1ce   : >> { %v959_v40 = vpop.permute.xlu0 %958 }
 0x1cf   : >> { %v976_v41 = vsel %vm974_vm14, %v959_v40, %v1195_v39 }
 0x1d0   : >> { %1196 = vst [vmem:[%s1021_s17 + $0x14] sm:$0x1] %v976_v41 }
 0x1d1 PF: > { %s13_s12 = sadd.s32 1, %s1279_s12  }
 0x1d2   : > { %p10_p8 = scmp.ge.s32.totalorder %s13_s12, 4  }
 0x1d4   :  { %12 = sbr.rel (!%p10_p8) target bundleno = 1 (0x1), region = 87 }

</bundles_post_ra>
